<compile_context>
chip_gen: v7x
topology: tpu7x:2x2x1
jax: 0.10.0
libtpu: 0.0.40
codegen_flags: <defaults>
</compile_context>

<pallas_src>
import functools

import jax
import jax.numpy as jnp
from jax.experimental import pallas as pl
from jax.experimental.pallas import tpu as pltpu

NEG_INF = -1e30


# ----------------------------------------------------------------------------
# Fused Pallas kernel: one batch element per grid step
# ----------------------------------------------------------------------------
def _decoder_kernel(xup_ref, aux_ref, w_aux_ref, b_aux_ref,
                    w_conv_ref, b_conv_ref, w_lin_ref, b_lin_ref,
                    feat_ref, prob_ref, *, kernel_size):
    """Shapes (per grid step, channels-last):
       xup_ref  (1, T2, C_in)   : 2x-upsampled input
       aux_ref  (1, T2, A)      : aux features
       w_aux    (A, C_out)      : aux_conv.weight[:, :, 0].T
       w_conv   (K, C_in, C_out): conv.weight transposed to (K, C_in, C_out)
       w_lin    (C_out, CPAD)   : linear.weight.T, class dim zero-padded to CPAD
       b_lin    (1, CPAD)       : padded entries = -1e30 (masked out of softmax)
       feat_ref (1, T2, C_out)  : conv output (== returned `x`, eval dropout = id)
       prob_ref (1, T2, CPAD)   : softmax over classes (lane-dense)
    """
    K = kernel_size
    pad = (K - 1) // 2

    x = xup_ref[0]                                         # (T2, C_in)
    a = aux_ref[0]                                         # (T2, A)
    T2 = x.shape[0]

    # aux 1x1 conv (pure channel matmul) + residual add with the upsampled x.
    h = x + jnp.dot(a, w_aux_ref[...],
                    preferred_element_type=jnp.float32) + b_aux_ref[...]

    # 'same' Conv1d over time as K statically-unrolled shifted channel matmuls.
    if pad > 0:
        zpad = jnp.zeros((pad, h.shape[1]), h.dtype)
        hp = jnp.concatenate([zpad, h, zpad], axis=0)      # (T2 + 2*pad, C_in)
    else:
        hp = h
    acc = jnp.zeros((T2, w_conv_ref.shape[2]), jnp.float32)
    for j in range(K):                                     # static unroll
        acc = acc + jnp.dot(hp[j:j + T2, :], w_conv_ref[j],
                            preferred_element_type=jnp.float32)
    feat = acc + b_conv_ref[...]
    feat_ref[0] = feat

    # Linear to (padded) classes, then softmax over the class (lane) axis.
    logits = jnp.dot(feat, w_lin_ref[...],
                     preferred_element_type=jnp.float32) + b_lin_ref[...]
    m = jnp.max(logits, axis=-1, keepdims=True)
    e = jnp.exp(logits - m)
    prob_ref[0] = e / jnp.sum(e, axis=-1, keepdims=True)


# ----------------------------------------------------------------------------
# Wrapper (layout glue + the two nearest-neighbour Upsamples)
# ----------------------------------------------------------------------------
def decoder_tcfpn_forward(x, aux, params, scale_factor):
    """Equivalent to Decoder_TCFPN.forward.  x: (B, C_in, T), aux: (B, A, 2T) or None.
    Returns (x_feat, x_out) with x_feat (B, C_out, 2T), x_out (B, nc, 2T*scale)."""
    w_aux, b_aux = params["w_aux"], params["b_aux"]
    w_conv, b_conv = params["w_conv"], params["b_conv"]
    w_lin, b_lin = params["w_lin"], params["b_lin"]
    num_classes = params["num_classes"]

    B, C_in, T = x.shape
    T2 = 2 * T
    K, _, C_out = w_conv.shape
    A = w_aux.shape[0]
    CPAD = w_lin.shape[1]

    # channels-last + nearest x2 upsample along time
    x_up = jnp.repeat(jnp.transpose(x, (0, 2, 1)), 2, axis=1)        # (B, 2T, C_in)
    if aux is not None:
        aux_cl = jnp.transpose(aux, (0, 2, 1))                        # (B, 2T, A)
        b_aux_eff = b_aux
    else:
        # aux path disabled exactly like the torch `if aux != None` branch
        aux_cl = jnp.zeros((B, T2, A), x.dtype)
        b_aux_eff = jnp.zeros_like(b_aux)

    kernel = functools.partial(_decoder_kernel, kernel_size=K)

    feat_cl, prob_cl = pl.pallas_call(
        kernel,
        out_shape=(jax.ShapeDtypeStruct((B, T2, C_out), jnp.float32),
                   jax.ShapeDtypeStruct((B, T2, CPAD), jnp.float32)),
        grid=(B,),
        in_specs=[
            pl.BlockSpec((1, T2, C_in), lambda b: (b, 0, 0)),
            pl.BlockSpec((1, T2, A), lambda b: (b, 0, 0)),
            pl.BlockSpec((A, C_out), lambda b: (0, 0)),
            pl.BlockSpec((1, C_out), lambda b: (0, 0)),
            pl.BlockSpec((K, C_in, C_out), lambda b: (0, 0, 0)),
            pl.BlockSpec((1, C_out), lambda b: (0, 0)),
            pl.BlockSpec((C_out, CPAD), lambda b: (0, 0)),
            pl.BlockSpec((1, CPAD), lambda b: (0, 0)),
        ],
        out_specs=(pl.BlockSpec((1, T2, C_out), lambda b: (b, 0, 0)),
                   pl.BlockSpec((1, T2, CPAD), lambda b: (b, 0, 0))),
        compiler_params=pltpu.CompilerParams(dimension_semantics=("parallel",)),
    )(x_up, aux_cl, w_aux, b_aux_eff.reshape(1, -1), w_conv,
      b_conv.reshape(1, -1), w_lin, b_lin.reshape(1, -1))

    # back to torch layout (B, C, T); drop lane padding; nearest upsample_out
    feat = jnp.transpose(feat_cl, (0, 2, 1))                          # (B, C_out, 2T)
    probs = jnp.transpose(prob_cl[:, :, :num_classes], (0, 2, 1))     # (B, nc, 2T)
    x_out = jnp.repeat(probs, int(scale_factor), axis=2)              # upsample_out
    return feat, x_out


# ----------------------------------------------------------------------------
# Deterministic parameter construction (kernel-friendly layouts)
# ----------------------------------------------------------------------------
def _uniform(key, shape, scale):
    return jax.random.uniform(key, shape, jnp.float32, minval=-scale, maxval=scale)


def make_params(key, in_channels, out_channels, aux_in, kernel_size, num_classes):
    # The torch module adds upsample(x) [in_channels] to aux_conv(aux) [out_channels]
    # and then feeds it to conv(in_channels -> out_channels), so in == out channels.
    assert in_channels == out_channels, "x + aux_conv(aux) requires in_ch == out_ch"
    assert kernel_size % 2 == 1, "'same' padding requires an odd kernel_size"

    cpad = ((num_classes + 127) // 128) * 128
    k1, k2, k3, k4, k5, k6 = jax.random.split(key, 6)
    s_aux = 1.0 / jnp.sqrt(float(aux_in))
    s_conv = 1.0 / jnp.sqrt(float(in_channels * kernel_size))
    s_lin = 1.0 / jnp.sqrt(float(out_channels))

    w_lin = _uniform(k5, (out_channels, num_classes), s_lin)
    b_lin = _uniform(k6, (num_classes,), s_lin)
    # lane-dense padding of the class dim; padded bias -1e30 so softmax ignores it
    w_lin_p = jnp.zeros((out_channels, cpad), jnp.float32).at[:, :num_classes].set(w_lin)
    b_lin_p = jnp.full((cpad,), NEG_INF, jnp.float32).at[:num_classes].set(b_lin)

    return {
        # w_aux  = torch aux_conv.weight[:, :, 0].T        -> (aux_in, C_out)
        # w_conv = torch conv.weight.transpose(2, 1, 0)    -> (K, C_in, C_out)
        # w_lin  = torch linear.weight.T (class-padded)    -> (C_out, CPAD)
        "w_aux": _uniform(k1, (aux_in, out_channels), s_aux),
        "b_aux": _uniform(k2, (out_channels,), s_aux),
        "w_conv": _uniform(k3, (kernel_size, in_channels, out_channels), s_conv),
        "b_conv": _uniform(k4, (out_channels,), s_conv),
        "w_lin": w_lin_p,
        "b_lin": b_lin_p,
        "num_classes": num_classes,
    }


# ----------------------------------------------------------------------------
if __name__ == "__main__":
    B, T = 2, 16
    IN_CH = OUT_CH = 64
    AUX_IN = 32
    KSIZE = 3
    NUM_CLASSES = 11
    SCALE = 2

    key = jax.random.PRNGKey(0)
    kp, kx, ka = jax.random.split(key, 3)

    params = make_params(kp, IN_CH, OUT_CH, AUX_IN, KSIZE, NUM_CLASSES)
    x = jax.random.normal(kx, (B, IN_CH, T), jnp.float32)
    aux = jax.random.normal(ka, (B, AUX_IN, 2 * T), jnp.float32)

    feat, x_out = decoder_tcfpn_forward(x, aux, params, SCALE)
    feat, x_out = jax.block_until_ready((feat, x_out))

    assert feat.shape == (B, OUT_CH, 2 * T), feat.shape
    assert x_out.shape == (B, NUM_CLASSES, 2 * T * SCALE), x_out.shape
    assert bool(jnp.all(jnp.isfinite(feat)))
    assert bool(jnp.all(jnp.isfinite(x_out)))
    # softmax over the class dim must sum to 1 at every time step
    assert bool(jnp.allclose(jnp.sum(x_out, axis=1), 1.0, atol=1e-4))
    print("KERNEL_OK")
</pallas_src>

<mosaic_0001>
module attributes {stable_mosaic.version = 11 : i64} {
  func.func @_decoder_kernel(%arg0: i32, %arg1: memref<1x32x64xf32, #tpu.memory_space<vmem>>, %arg2: memref<1x32x32xf32, #tpu.memory_space<vmem>>, %arg3: memref<32x64xf32, #tpu.memory_space<vmem>>, %arg4: memref<1x64xf32, #tpu.memory_space<vmem>>, %arg5: memref<3x64x64xf32, #tpu.memory_space<vmem>>, %arg6: memref<1x64xf32, #tpu.memory_space<vmem>>, %arg7: memref<64x128xf32, #tpu.memory_space<vmem>>, %arg8: memref<1x128xf32, #tpu.memory_space<vmem>>, %arg9: memref<1x32x64xf32, #tpu.memory_space<vmem>>, %arg10: memref<1x32x128xf32, #tpu.memory_space<vmem>>) attributes {dimension_semantics = [#tpu.dimension_semantics<parallel>], iteration_bounds = array<i64: 2>, scalar_prefetch = 0 : i64, scratch_operands = 0 : i64, tpu.core_type = #tpu.core_type<tc>, window_params = [{transform_indices = @transform_0, window_bounds = array<i64: 1, 32, 64>}, {transform_indices = @transform_1, window_bounds = array<i64: 1, 32, 32>}, {pipeline_mode = #tpu.pipeline_mode<synchronous>, transform_indices = @transform_2, window_bounds = array<i64: 32, 64>}, {pipeline_mode = #tpu.pipeline_mode<synchronous>, transform_indices = @transform_3, window_bounds = array<i64: 1, 64>}, {pipeline_mode = #tpu.pipeline_mode<synchronous>, transform_indices = @transform_4, window_bounds = array<i64: 3, 64, 64>}, {pipeline_mode = #tpu.pipeline_mode<synchronous>, transform_indices = @transform_5, window_bounds = array<i64: 1, 64>}, {pipeline_mode = #tpu.pipeline_mode<synchronous>, transform_indices = @transform_6, window_bounds = array<i64: 64, 128>}, {pipeline_mode = #tpu.pipeline_mode<synchronous>, transform_indices = @transform_7, window_bounds = array<i64: 1, 128>}, {transform_indices = @transform_8, window_bounds = array<i64: 1, 32, 64>}, {transform_indices = @transform_9, window_bounds = array<i64: 1, 32, 128>}]} {
    %c0 = arith.constant 0 : index
    %c0_0 = arith.constant 0 : index
    %c0_1 = arith.constant 0 : index
    %0 = vector.load %arg1[%c0, %c0_0, %c0_1] : memref<1x32x64xf32, #tpu.memory_space<vmem>>, vector<1x32x64xf32>
    %1 = vector.shape_cast %0 : vector<1x32x64xf32> to vector<32x64xf32>
    %c0_2 = arith.constant 0 : index
    %c0_3 = arith.constant 0 : index
    %c0_4 = arith.constant 0 : index
    %2 = vector.load %arg2[%c0_2, %c0_3, %c0_4] : memref<1x32x32xf32, #tpu.memory_space<vmem>>, vector<1x32x32xf32>
    %3 = vector.shape_cast %2 : vector<1x32x32xf32> to vector<32x32xf32>
    %c0_5 = arith.constant 0 : index
    %c0_6 = arith.constant 0 : index
    %4 = vector.load %arg3[%c0_5, %c0_6] : memref<32x64xf32, #tpu.memory_space<vmem>>, vector<32x64xf32>
    %cst = arith.constant dense<0.000000e+00> : vector<32x64xf32>
    %5 = tpu.matmul %3, %4, %cst {dimension_numbers = #tpu.dot_dimension_numbers<[1], [0], [0], [1], [0, 0, 1, 1], [], []>} : vector<32x32xf32>, vector<32x64xf32>, vector<32x64xf32> -> vector<32x64xf32>
    %6 = arith.addf %1, %5 : vector<32x64xf32>
    %c0_7 = arith.constant 0 : index
    %c0_8 = arith.constant 0 : index
    %7 = vector.load %arg4[%c0_7, %c0_8] : memref<1x64xf32, #tpu.memory_space<vmem>>, vector<1x64xf32>
    %8 = vector.broadcast %7 : vector<1x64xf32> to vector<32x64xf32>
    %9 = arith.addf %6, %8 : vector<32x64xf32>
    %cst_9 = arith.constant 0.000000e+00 : f32
    %10 = vector.broadcast %cst_9 : f32 to vector<1x64xf32>
    %11 = tpu.concatenate %10, %9, %10 in 0 : vector<1x64xf32>, vector<32x64xf32>, vector<1x64xf32> -> vector<34x64xf32>
    %cst_10 = arith.constant 0.000000e+00 : f32
    %12 = vector.broadcast %cst_10 : f32 to vector<32x64xf32>
    %13 = vector.extract_strided_slice %11 {offsets = [0, 0], sizes = [32, 64], strides = [1, 1]} : vector<34x64xf32> to vector<32x64xf32>
    %c0_11 = arith.constant 0 : index
    %c0_12 = arith.constant 0 : index
    %c0_13 = arith.constant 0 : index
    %14 = vector.load %arg5[%c0_11, %c0_12, %c0_13] : memref<3x64x64xf32, #tpu.memory_space<vmem>>, vector<1x64x64xf32>
    %15 = vector.shape_cast %14 : vector<1x64x64xf32> to vector<64x64xf32>
    %cst_14 = arith.constant dense<0.000000e+00> : vector<32x64xf32>
    %16 = tpu.matmul %13, %15, %cst_14 {dimension_numbers = #tpu.dot_dimension_numbers<[1], [0], [0], [1], [0, 0, 1, 1], [], []>} : vector<32x64xf32>, vector<64x64xf32>, vector<32x64xf32> -> vector<32x64xf32>
    %17 = arith.addf %12, %16 : vector<32x64xf32>
    %18 = vector.extract_strided_slice %11 {offsets = [1, 0], sizes = [32, 64], strides = [1, 1]} : vector<34x64xf32> to vector<32x64xf32>
    %c1 = arith.constant 1 : index
    %c0_15 = arith.constant 0 : index
    %c0_16 = arith.constant 0 : index
    %19 = vector.load %arg5[%c1, %c0_15, %c0_16] : memref<3x64x64xf32, #tpu.memory_space<vmem>>, vector<1x64x64xf32>
    %20 = vector.shape_cast %19 : vector<1x64x64xf32> to vector<64x64xf32>
    %cst_17 = arith.constant dense<0.000000e+00> : vector<32x64xf32>
    %21 = tpu.matmul %18, %20, %cst_17 {dimension_numbers = #tpu.dot_dimension_numbers<[1], [0], [0], [1], [0, 0, 1, 1], [], []>} : vector<32x64xf32>, vector<64x64xf32>, vector<32x64xf32> -> vector<32x64xf32>
    %22 = arith.addf %17, %21 : vector<32x64xf32>
    %23 = vector.extract_strided_slice %11 {offsets = [2, 0], sizes = [32, 64], strides = [1, 1]} : vector<34x64xf32> to vector<32x64xf32>
    %c2 = arith.constant 2 : index
    %c0_18 = arith.constant 0 : index
    %c0_19 = arith.constant 0 : index
    %24 = vector.load %arg5[%c2, %c0_18, %c0_19] : memref<3x64x64xf32, #tpu.memory_space<vmem>>, vector<1x64x64xf32>
    %25 = vector.shape_cast %24 : vector<1x64x64xf32> to vector<64x64xf32>
    %cst_20 = arith.constant dense<0.000000e+00> : vector<32x64xf32>
    %26 = tpu.matmul %23, %25, %cst_20 {dimension_numbers = #tpu.dot_dimension_numbers<[1], [0], [0], [1], [0, 0, 1, 1], [], []>} : vector<32x64xf32>, vector<64x64xf32>, vector<32x64xf32> -> vector<32x64xf32>
    %27 = arith.addf %22, %26 : vector<32x64xf32>
    %c0_21 = arith.constant 0 : index
    %c0_22 = arith.constant 0 : index
    %28 = vector.load %arg6[%c0_21, %c0_22] : memref<1x64xf32, #tpu.memory_space<vmem>>, vector<1x64xf32>
    %29 = vector.broadcast %28 : vector<1x64xf32> to vector<32x64xf32>
    %30 = arith.addf %27, %29 : vector<32x64xf32>
    %c0_23 = arith.constant 0 : index
    %c0_24 = arith.constant 0 : index
    %c0_25 = arith.constant 0 : index
    %31 = vector.load %arg9[%c0_23, %c0_24, %c0_25] : memref<1x32x64xf32, #tpu.memory_space<vmem>>, vector<1x32x64xf32>
    %32 = vector.shape_cast %31 : vector<1x32x64xf32> to vector<32x64xf32>
    %33 = vector.shape_cast %30 : vector<32x64xf32> to vector<1x32x64xf32>
    tpu.vector_store %arg9[%c0_23, %c0_24, %c0_25], %33 {strides = array<i32>} : memref<1x32x64xf32, #tpu.memory_space<vmem>>, vector<1x32x64xf32>,
    %c0_26 = arith.constant 0 : index
    %c0_27 = arith.constant 0 : index
    %34 = vector.load %arg7[%c0_26, %c0_27] : memref<64x128xf32, #tpu.memory_space<vmem>>, vector<64x128xf32>
    %cst_28 = arith.constant dense<0.000000e+00> : vector<32x128xf32>
    %35 = tpu.matmul %30, %34, %cst_28 {dimension_numbers = #tpu.dot_dimension_numbers<[1], [0], [0], [1], [0, 0, 1, 1], [], []>} : vector<32x64xf32>, vector<64x128xf32>, vector<32x128xf32> -> vector<32x128xf32>
    %c0_29 = arith.constant 0 : index
    %c0_30 = arith.constant 0 : index
    %36 = vector.load %arg8[%c0_29, %c0_30] : memref<1x128xf32, #tpu.memory_space<vmem>>, vector<1x128xf32>
    %37 = vector.broadcast %36 : vector<1x128xf32> to vector<32x128xf32>
    %38 = arith.addf %35, %37 : vector<32x128xf32>
    %cst_31 = arith.constant dense<0xFF800000> : vector<32xf32>
    %39 = vector.multi_reduction <maximumf>, %38, %cst_31 [1] : vector<32x128xf32> to vector<32xf32>
    %40 = vector.shape_cast %39 : vector<32xf32> to vector<32x1xf32>
    %41 = vector.broadcast %40 : vector<32x1xf32> to vector<32x128xf32>
    %42 = arith.subf %38, %41 : vector<32x128xf32>
    %43 = math.exp %42 : vector<32x128xf32>
    %cst_32 = arith.constant dense<0.000000e+00> : vector<32xf32>
    %44 = vector.multi_reduction <add>, %43, %cst_32 [1] : vector<32x128xf32> to vector<32xf32>
    %45 = vector.shape_cast %44 : vector<32xf32> to vector<32x1xf32>
    %46 = vector.broadcast %45 : vector<32x1xf32> to vector<32x128xf32>
    %47 = arith.divf %43, %46 : vector<32x128xf32>
    %c0_33 = arith.constant 0 : index
    %c0_34 = arith.constant 0 : index
    %c0_35 = arith.constant 0 : index
    %48 = vector.load %arg10[%c0_33, %c0_34, %c0_35] : memref<1x32x128xf32, #tpu.memory_space<vmem>>, vector<1x32x128xf32>
    %49 = vector.shape_cast %48 : vector<1x32x128xf32> to vector<32x128xf32>
    %50 = vector.shape_cast %47 : vector<32x128xf32> to vector<1x32x128xf32>
    tpu.vector_store %arg10[%c0_33, %c0_34, %c0_35], %50 {strides = array<i32>} : memref<1x32x128xf32, #tpu.memory_space<vmem>>, vector<1x32x128xf32>,
    return
  }
  func.func @transform_0(%arg0: i32) -> (i32, i32, i32) {
    %c0_i32 = arith.constant 0 : i32
    %c0_i32_0 = arith.constant 0 : i32
    %c0_i32_1 = arith.constant 0 : i32
    return %arg0, %c0_i32, %c0_i32_0 : i32, i32, i32
  }
  func.func @transform_1(%arg0: i32) -> (i32, i32, i32) {
    %c0_i32 = arith.constant 0 : i32
    %c0_i32_0 = arith.constant 0 : i32
    %c0_i32_1 = arith.constant 0 : i32
    return %arg0, %c0_i32, %c0_i32_0 : i32, i32, i32
  }
  func.func @transform_2(%arg0: i32) -> (i32, i32) {
    %c0_i32 = arith.constant 0 : i32
    %c0_i32_0 = arith.constant 0 : i32
    %c0_i32_1 = arith.constant 0 : i32
    return %c0_i32, %c0_i32_0 : i32, i32
  }
  func.func @transform_3(%arg0: i32) -> (i32, i32) {
    %c0_i32 = arith.constant 0 : i32
    %c0_i32_0 = arith.constant 0 : i32
    %c0_i32_1 = arith.constant 0 : i32
    return %c0_i32, %c0_i32_0 : i32, i32
  }
  func.func @transform_4(%arg0: i32) -> (i32, i32, i32) {
    %c0_i32 = arith.constant 0 : i32
    %c0_i32_0 = arith.constant 0 : i32
    %c0_i32_1 = arith.constant 0 : i32
    %c0_i32_2 = arith.constant 0 : i32
    return %c0_i32, %c0_i32_0, %c0_i32_1 : i32, i32, i32
  }
  func.func @transform_5(%arg0: i32) -> (i32, i32) {
    %c0_i32 = arith.constant 0 : i32
    %c0_i32_0 = arith.constant 0 : i32
    %c0_i32_1 = arith.constant 0 : i32
    return %c0_i32, %c0_i32_0 : i32, i32
  }
  func.func @transform_6(%arg0: i32) -> (i32, i32) {
    %c0_i32 = arith.constant 0 : i32
    %c0_i32_0 = arith.constant 0 : i32
    %c0_i32_1 = arith.constant 0 : i32
    return %c0_i32, %c0_i32_0 : i32, i32
  }
  func.func @transform_7(%arg0: i32) -> (i32, i32) {
    %c0_i32 = arith.constant 0 : i32
    %c0_i32_0 = arith.constant 0 : i32
    %c0_i32_1 = arith.constant 0 : i32
    return %c0_i32, %c0_i32_0 : i32, i32
  }
  func.func @transform_8(%arg0: i32) -> (i32, i32, i32) {
    %c0_i32 = arith.constant 0 : i32
    %c0_i32_0 = arith.constant 0 : i32
    %c0_i32_1 = arith.constant 0 : i32
    return %arg0, %c0_i32, %c0_i32_0 : i32, i32, i32
  }
  func.func @transform_9(%arg0: i32) -> (i32, i32, i32) {
    %c0_i32 = arith.constant 0 : i32
    %c0_i32_0 = arith.constant 0 : i32
    %c0_i32_1 = arith.constant 0 : i32
    return %arg0, %c0_i32, %c0_i32_0 : i32, i32, i32
  }
}

</mosaic_0001>

<bundles_post_ra>
// kernel: tpu_custom_call.1
= control target key start
LH: loop header
LB: loop body
LE: loop exit
PB: predicated region body
PF: predicated region fallthrough
CT: control target
= control target key end

     0   :  { %s2422_s0 = inlined_call_operand.hbm [shape: f32[2,32,64], index: 0, kind: input, shape index: {}]   ;;  %s2423_s1 = inlined_call_operand.hbm [shape: f32[2,32,32], index: 1, kind: input, shape index: {}]   ;;  %s2424_s2 = inlined_call_operand.hbm [shape: f32[32,64], index: 2, kind: input, shape index: {}]   ;;  %s2425_s3 = inlined_call_operand.vmem [shape: f32[1,64], index: 3, kind: input, shape index: {}]   ;;  %s2426_s4 = inlined_call_operand.hbm [shape: f32[3,64,64], index: 4, kind: input, shape index: {}]   ;;  %s2427_s5 = inlined_call_operand.vmem [shape: f32[1,64], index: 5, kind: input, shape index: {}]   ;;  %s2428_s6 = inlined_call_operand.hbm [shape: f32[64,128], index: 6, kind: input, shape index: {}]   ;;  %s2429_s7 = inlined_call_operand.vmem [shape: f32[1,128], index: 7, kind: input, shape index: {}]   ;;  %s2430_s8 = inlined_call_operand.hbm [shape: f32[2,32,64], index: 8, kind: output, shape index: {0}]   ;;  %s2431_s9 = inlined_call_operand.hbm [shape: f32[2,32,128], index: 9, kind: output, shape index: {1}]  }
   0x1   :  { %2442 = sst [smem:[#allocation23_spill]] %s2422_s0 }
   0x2   :  { %2443 = sst [smem:[#allocation24_spill]] %s2424_s2 }
   0x3   :  { %2444 = sst [smem:[#allocation25_spill]] %s2426_s4 }
   0x4   :  { %2445 = sst [smem:[#allocation26_spill]] %s2428_s6 }
   0x5   :  { %2446 = sst [smem:[#allocation27_spill]] %s2431_s9 }
   0x6   :  { %15 = vsyncpa [#allocation3], 0 }
   0x7   :  { %17 = vsyncpa [#allocation3 + $0x1], 0 }
   0x8   :  { %18 = vsyncpa [#allocation6], 0 }
   0x9   :  { %20 = vsyncpa [#allocation6 + $0x1], 0 }
   0xa   :  { %21 = vsyncpa [#allocation9], 0 }
   0xb   :  { %22 = vsyncpa [#allocation4], 0 }
   0xc   :  { %24 = vsyncpa [#allocation4 + $0x1], 0 }
   0xd   :  { %25 = vsyncpa [#allocation13], 0 }
   0xe   :  { %27 = vsyncpa [#allocation13 + $0x1], 0  ;;  %s1993_s30 = smov 0   ;;  %s1995_s10 = smov 0  }
   0xf   :  { %s1997_s11 = smov 0   ;;  %s1999_s12 = smov 0  }
  0x10 LB: > { %2447 = sst [smem:[#allocation20_spill]] %s1918_s30  ;;  %s2014_s13 = sadd.s32 4294967295, %s1930_s12   ;;  %s1930_s12 = sphi %s1999_s12, %s2479_s12   ;;  %s1926_s11 = sphi %s1997_s11, %s2478_s11   ;;  %s1922_s10 = sphi %s1995_s10, %s2477_s10   ;;  %s1918_s30 = sphi %s1993_s30, %s2476_s30  }
  0x11   : > { %s1276_s14 = sadd.s32 4294967294, %s1930_s12   ;;  %p53_p0 = scmp.ne.s32.totalorder %s1922_s10, %s1918_s30 }
  0x12   : > { %p2432_p1 = scmp.eq.s32.totalorder %s2014_s13, 0  ;;  %p235_p3 = scmp.eq.s32.totalorder %s1276_s14, 1 }
  0x13   : > { %p1277_p5 = scmp.ge.s32.totalorder %s1930_s12, 1  ;;  %p268_p7 = scmp.lt.s32.totalorder %s1930_s12, 3 }
  0x14   : > { %p2023_p4 = por %p2432_p1, %p53_p0  ;;  %p2028_p6 = por %p235_p3, %p53_p0 }
  0x15   : > { %p2033_p8 = pnand %p1277_p5, %p268_p7  ;;  %s1932_s18 = smov [#allocation7]  }
  0x16   : > { %s2448_s15 = scalar_select %p2023_p4, 1, 0 }
  0x17   : > { %s2449_s16 = scalar_select %p2028_p6, 1, 0 }
  0x18   : > { %s2451_s17 = scalar_select %p2033_p8, 1, 0 }
  0x19   : > { %2450 = sst [smem:[#allocation21_spill]] %s2449_s16  ;;  %s280_s19 = sshll.u32 %s1932_s18, 4  ;;  %s2037_s19 = int_to_ptr.vmem [resolvable:$true] %s280_s19 }
  0x1a   : > { %p1589_p9 = pneg %p2033_p8  ;;  %s1933_s21 = smov [#allocation8]  }
  0x1b   : > { %s296_s22 = sshll.u32 %s1933_s21, 4  ;;  %s1934_s23 = smov [#allocation10]   ;;  %s2048_s22 = int_to_ptr.vmem [resolvable:$true] %s296_s22 }
  0x1c   : > { %p2044_p11 = pnand %p1589_p9, %p2432_p1  ;;  %s2050_s24 = sshll.u32 %s1934_s23, 4  ;;  %s313_s24 = int_to_ptr.vmem [resolvable:$true] %s2050_s24 }
  0x1d   : > { %s2453_s2 = sld [smem:[#allocation24_spill]] }
  0x1e   : > { %p2060_p13 = pneg %p2044_p11 }
  0x23   : > { %s1676_s27 = scalar_lea.hbm %s2453_s2, 512 }
  0x24   : > { %p1677_p12 = scmp.ne.s32.totalorder %s2453_s2, %s1676_s27  ;;  %p1683_p5 = scmp.lt.u32.totalorder %s1676_s27, %s2453_s2 }
  0x26   : > { %p1679_p0 = pnand %p2060_p13, %p1677_p12 }
  0x28   : > { %p1680_p3 = pneg %p1679_p0 }
  0x2a   : > { %p1685_p7 = pnand %p1683_p5, %p1680_p3 }
  0x2c   : > { %1688 = shalt.err (!%p1685_p7)
}
  0x2d   : > { %s1689_s23 = scalar_lea.vmem %s2037_s19, 512  ;;  %p1697_p2 = scmp.lt.s32.totalorder %s2037_s19, %s2037_s19 }
  0x2e   : > { %p1690_p9 = scmp.ne.s32.totalorder %s2037_s19, %s1689_s23  ;;  %p1698_p6 = scmp.lt.s32.totalorder %s1689_s23, %s1689_s23 }
  0x30   : > { %p1692_p10 = pnand %p1690_p9, %p2060_p13  ;;  %p1699_p12 = por %p1698_p6, %p1697_p2 }
  0x32   : > { %p1693_p1 = pneg %p1692_p10 }
  0x34   : > { %p1700_p0 = pnand %p1699_p12, %p1693_p1 }
  0x36   : > { %1703 = shalt.err (!%p1700_p0)
}
  0x37   : > { %s2438_s25 = smov 128   ;;  %s2440_s26 = smov 8  }
  0x38   : > { %1592 = dma.hbm_to_vmem [thread:$0]  (!%p2044_p11), %s2453_s2, 512, %s2037_s19, [#allocation6], %s2438_s25, %s2438_s25, %s2440_s26  }
  0x39   : > { %s2455_s4 = sld [smem:[#allocation25_spill]] }
  0x3f   : > { %s1704_s21 = scalar_lea.hbm %s2455_s4, 3072 }
  0x40   : > { %p1705_p1 = scmp.ne.s32.totalorder %s2455_s4, %s1704_s21  ;;  %p1711_p10 = scmp.lt.u32.totalorder %s1704_s21, %s2455_s4 }
  0x42   : > { %p1707_p2 = pnand %p1705_p1, %p2060_p13 }
  0x44   : > { %p1708_p6 = pneg %p1707_p2 }
  0x46   : > { %p1713_p3 = pnand %p1711_p10, %p1708_p6 }
  0x48   : > { %1716 = shalt.err (!%p1713_p3)
}
  0x49   : > { %s1717_s19 = scalar_lea.vmem %s2048_s22, 3072  ;;  %p1725_p12 = scmp.lt.s32.totalorder %s2048_s22, %s2048_s22 }
  0x4a   : > { %p1718_p5 = scmp.ne.s32.totalorder %s2048_s22, %s1717_s19  ;;  %p1726_p0 = scmp.lt.s32.totalorder %s1717_s19, %s1717_s19 }
  0x4c   : > { %p1720_p7 = pnand %p1718_p5, %p2060_p13  ;;  %p1727_p1 = por %p1726_p0, %p1725_p12 }
  0x4e   : > { %p1721_p9 = pneg %p1720_p7 }
  0x50   : > { %p1728_p2 = pnand %p1727_p1, %p1721_p9 }
  0x52   : > { %1731 = shalt.err (!%p1728_p2)
}
  0x53   : > { %1595 = dma.hbm_to_vmem [thread:$0]  (!%p2044_p11), %s2455_s4, 3072, %s2048_s22, [#allocation9], %s2438_s25, %s2438_s25, %s2440_s26  }
  0x54   : > { %s2456_s6 = sld [smem:[#allocation26_spill]] }
  0x5a   : > { %s1732_s28 = scalar_lea.hbm %s2456_s6, 1024 }
  0x5b   : > { %p1733_p6 = scmp.ne.s32.totalorder %s2456_s6, %s1732_s28  ;;  %p1739_p5 = scmp.lt.u32.totalorder %s1732_s28, %s2456_s6 }
  0x5d   : > { %p1735_p10 = pnand %p1733_p6, %p2060_p13 }
  0x5f   : > { %p1736_p3 = pneg %p1735_p10 }
  0x61   : > { %p1741_p7 = pnand %p1739_p5, %p1736_p3 }
  0x63   : > { %1744 = shalt.err (!%p1741_p7)
}
  0x64   : > { %s1745_s19 = scalar_lea.vmem %s313_s24, 1024  ;;  %p1753_p1 = scmp.lt.s32.totalorder %s313_s24, %s313_s24 }
  0x65   : > { %p1746_p9 = scmp.ne.s32.totalorder %s313_s24, %s1745_s19  ;;  %p1754_p2 = scmp.lt.s32.totalorder %s1745_s19, %s1745_s19 }
  0x67   : > { %p1748_p12 = pnand %p1746_p9, %p2060_p13  ;;  %p1755_p4 = por %p1754_p2, %p1753_p1 }
  0x69   : > { %p1749_p0 = pneg %p1748_p12 }
  0x6b   : > { %p1756_p8 = pnand %p1755_p4, %p1749_p0 }
  0x6d   : > { %1759 = shalt.err (!%p1756_p8)
}
  0x6e   : > { %1598 = dma.hbm_to_vmem [thread:$0]  (!%p2044_p11), %s2456_s6, 1024, %s313_s24, [#allocation9], %s2438_s25, %s2438_s25, %s2440_s26  }
  0x6f   : > { %s2133_s14 = sadd.s32 1, %s1930_s12   ;;  %s40_s30 = sadd.s32 1, %s1926_s11 }
  0x70   : > { %s37_s20 = ssub.s32 %s1930_s12, %s2133_s14  ;;  %p47_p8 = scmp.ne.s32.totalorder %s1926_s11, %s1922_s10 }
  0x71   : > { %p38_p4 = scmp.eq.s32.totalorder %s37_s20, 0  ;;  %p48_p13 = scmp.eq.s32.totalorder %s1930_s12, 0 }
  0x72   : > { %p1616_p6 = scmp.lt.s32.totalorder %s1930_s12, 2  ;;  %p2458_p3 = scmp.eq.s32.totalorder %s2014_s13, 1 }
  0x73   : > { %s2143_s16 = scalar_select %p38_p4, %s1926_s11, %s40_s30  }
  0x74   : > { %p49_p10 = por %p48_p13, %p47_p8  ;;  %p2147_p5 = por %p2458_p3, %p47_p8 }
  0x75   : > { %2457 = sst [smem:[#allocation22_spill]] %s2143_s16  ;;  %s329_s28 = sand.u32 1, %s1926_s11  }
  0x76   : > { %s1327_s29 = sshll.u32 %s1930_s12, 9  ;;  %s2153_s24 = sshll.u32 %s329_s28, 5 }
  0x77   : > { %s2460_s0 = sld [smem:[#allocation23_spill]]  ;;  %s333_s19 = scalar_lea.vmem [#allocation2], %s2153_s24 }
  0x78   : > { %s340_s22 = sshll.u32 %s333_s19, 4  ;;  %p2161_p11 = pnand %p1616_p6, %p49_p10  ;;  %s2165_s22 = int_to_ptr.vmem [resolvable:$true] %s340_s22 }
  0x79   : > { %s2170_s18 = scalar_lea.hbm %s2423_s1, %s1327_s29  ;;  %s2172_s21 = scalar_lea.sflag [#allocation3], %s329_s28 }
  0x7a   : > { %p1762_p9 = pneg %p2161_p11 }
  0x7d   : > { %s2158_s23 = scalar_lea.hbm %s2460_s0, %s1327_s29  ;;  %s1765_s2 = scalar_lea.hbm %s2460_s0, 1024 }
  0x7e   : > { %s1760_s25 = scalar_lea.hbm %s2158_s23, 512  ;;  %p1766_p1 = scmp.lt.u32.totalorder %s2158_s23, %s2460_s0 }
  0x7f   : > { %p1761_p7 = scmp.ne.s32.totalorder %s2158_s23, %s1760_s25  ;;  %p1767_p2 = scmp.lt.u32.totalorder %s1765_s2, %s1760_s25 }
  0x80   : > { %p1769_p8 = scmp.lt.u32.totalorder %s1760_s25, %s2158_s23 }
  0x81   : > { %p1763_p12 = pnand %p1762_p9, %p1761_p7  ;;  %p1768_p4 = por %p1767_p2, %p1766_p1 }
  0x83   : > { %p1764_p0 = pneg %p1763_p12  ;;  %p1770_p13 = por %p1769_p8, %p1768_p4 }
  0x85   : > { %p1771_p6 = pnand %p1770_p13, %p1764_p0 }
  0x87   : > { %1774 = shalt.err (!%p1771_p6)
}
  0x88   : > { %s1775_s28 = scalar_lea.vmem %s2165_s22, 512  ;;  %s1937_s26 = smov [#allocation2]  }
  0x89   : > { %p1776_p10 = scmp.ne.s32.totalorder %s2165_s22, %s1775_s28  ;;  %s1780_s29 = sshll.u32 %s1937_s26, 4  ;;  %s1781_s29 = int_to_ptr.vmem [resolvable:$false] %s1780_s29 }
  0x8a   : > { %s1782_s4 = scalar_lea.vmem %s1781_s29, 1024  ;;  %p1783_p12 = scmp.lt.s32.totalorder %s2165_s22, %s1781_s29 }
  0x8b   : > { %p1778_p3 = pnand %p1776_p10, %p1762_p9  ;;  %p1784_p1 = scmp.lt.s32.totalorder %s1782_s4, %s1775_s28 }
  0x8d   : > { %p1779_p7 = pneg %p1778_p3  ;;  %p1785_p2 = por %p1784_p1, %p1783_p12 }
  0x8f   : > { %p1786_p4 = pnand %p1785_p2, %p1779_p7 }
  0x91   : > { %1789 = shalt.err (!%p1786_p4)
}
  0x92   : > { %s2462_s2 = smov 8   ;;  %s2463_s6 = smov 128  }
  0x93   : > { %1602 = dma.hbm_to_vmem [thread:$0]  (!%p2161_p11), %s2158_s23, 512, %s2165_s22, %s2172_s21, %s2463_s6, %s2463_s6, %s2462_s2  }
  0x94   : > { %s354_s25 = scalar_lea.vmem [#allocation5], %s2153_s24  ;;  %s350_s30 = sand.u32 1, %s1930_s12  }
  0x95   : > { %s361_s20 = sshll.u32 %s354_s25, 4  ;;  %s2207_s19 = scalar_lea.sflag [#allocation6], %s350_s30  ;;  %s2205_s20 = int_to_ptr.vmem [resolvable:$true] %s361_s20 }
  0x96   : > { %s1790_s28 = scalar_lea.hbm %s2170_s18, 512  ;;  %s1795_s4 = scalar_lea.hbm %s2423_s1, 1024 }
  0x97   : > { %p1791_p0 = scmp.ne.s32.totalorder %s2170_s18, %s1790_s28  ;;  %p1796_p6 = scmp.lt.u32.totalorder %s2170_s18, %s2423_s1 }
  0x98   : > { %p1797_p10 = scmp.lt.u32.totalorder %s1795_s4, %s1790_s28  ;;  %p1799_p7 = scmp.lt.u32.totalorder %s1790_s28, %s2170_s18 }
  0x99   : > { %p1793_p8 = pnand %p1791_p0, %p1762_p9 }
  0x9a   : > { %p1798_p3 = por %p1797_p10, %p1796_p6 }
  0x9b   : > { %p1794_p13 = pneg %p1793_p8 }
  0x9c   : > { %p1800_p12 = por %p1799_p7, %p1798_p3 }
  0x9e   : > { %p1801_p1 = pnand %p1800_p12, %p1794_p13 }
  0xa0   : > { %1804 = shalt.err (!%p1801_p1)
}
  0xa1   : > { %s1805_s24 = scalar_lea.vmem %s2205_s20, 512  ;;  %s1938_s23 = smov [#allocation5]  }
  0xa2   : > { %p1806_p2 = scmp.ne.s32.totalorder %s2205_s20, %s1805_s24  ;;  %s1810_s22 = sshll.u32 %s1938_s23, 4  ;;  %s1811_s22 = int_to_ptr.vmem [resolvable:$false] %s1810_s22 }
  0xa3   : > { %s1812_s0 = scalar_lea.vmem %s1811_s22, 1024  ;;  %p1813_p8 = scmp.lt.s32.totalorder %s2205_s20, %s1811_s22 }
  0xa4   : > { %p1808_p4 = pnand %p1806_p2, %p1762_p9  ;;  %p1814_p6 = scmp.lt.s32.totalorder %s1812_s0, %s1805_s24 }
  0xa6   : > { %p1809_p0 = pneg %p1808_p4  ;;  %p1815_p10 = por %p1814_p6, %p1813_p8 }
  0xa8   : > { %p1816_p3 = pnand %p1815_p10, %p1809_p0 }
  0xaa   : > { %1819 = shalt.err (!%p1816_p3)
}
  0xab   : > { %1605 = dma.hbm_to_vmem [thread:$0]  (!%p2161_p11), %s2170_s18, 512, %s2205_s20, %s2207_s19, %s2463_s6, %s2463_s6, %s2462_s2  }
  0xac   : > { %p2464_p9 = scmp.ne.s32.totalorder %s2451_s17, 0 }
  0xad   : > { %s2239_s16 = sand.u32 (!%p2464_p9), 1, %s1922_s10   ;;  %p2465_p13 = scmp.ne.s32.totalorder (!%p2464_p9), %s2448_s15, 0 }
  0xae   : > { %373 = sbr.rel (%p2464_p9) target bundleno = 1207 (0x4b7), region = 52  ;;  %s2242_s21 = sshll.u32 (!%p2464_p9), %s2239_s16, 5 }
  0xaf   : > { %s376_s9 = scalar_lea.sflag (!%p2464_p9), [#allocation3], %s2239_s16  ;;  %s2246_s25 = scalar_lea.vmem (!%p2464_p9), [#allocation2], %s2242_s21 }
  0xb5   : > { %1893 = dma.done.wait (%p2465_p13), %s376_s9, 512  }
  0xb6   : > { %1895 = vsyncadd (%p2465_p13), %s376_s9, 4294966784  ;;  %s384_s17 = sand.u32 1, %s2014_s13   ;;  %s2254_s2 = scalar_lea.vmem [#allocation5], %s2242_s21 }
  0xb7   : > { %s385_s18 = scalar_lea.sflag [#allocation6], %s384_s17 }
  0xb8   : > { %1897 = dma.done.wait (%p2465_p13), %s385_s18, 512  }
  0xb9   : > { %1899 = vsyncadd (%p2465_p13), %s385_s18, 4294966784  ;;  %p2466_p11 = scmp.eq.s32.totalorder %s2014_s13, 0 }
  0xbb   : > { %1901 = dma.done.wait (%p2466_p11), [#allocation6], 512   ;;  %p2467_p7 = pmov %p2466_p11 }
  0xbd   : > { %1903 = vsyncadd (%p2467_p7), [#allocation6], 4294966784  ;;  %p2468_p12 = pmov %p2467_p7 }
  0xbe   : > { %p2469_p1 = pmov %p2467_p7 }
  0xbf   : > { %1905 = dma.done.wait (%p2468_p12), [#allocation9], 4096  }
  0xc0   : > { %1907 = vsyncadd (%p2469_p1), [#allocation9], 4294963200  ;;  %vm457_vm0 = vcmask 261120   ;;  %v453_v0 = vld [vmem:[#allocation7] sm:$0xff]  ;;  %v454_v1 = vld [vmem:[#allocation7 + $0x8] sm:$0xff]  ;;  %vm574_vm1 = vcmask 1040384  }
  0xc1   : > { %v455_v2 = vld [vmem:[#allocation7 + $0x10] sm:$0xff]  ;;  %v1489_v3 = vpack.c.bf16 %v454_v1, %v453_v0  ;;  %v456_v4 = vld [vmem:[#allocation7 + $0x18] sm:$0xff]  ;;  %v449_v5 = vld [vmem:[%s2254_s2] sm:$0xff]  ;;  %vm615_vm2 = vcmask 523264   ;;  %vm605_vm3 = vcmask 1046528   ;;  %vm811_vm4 = vcmask 1045504  }
  0xc2   : > { %v1493_v6 = vpack.c.bf16 %v456_v4, %v455_v2  ;;  %1395 = vmatprep.mubr.msk.f32.mxu0 %vm457_vm0, %v449_v5  ;;  %v586_v7 = vld [vmem:[#allocation8] sm:$0xff]  ;;  %v587_v8 = vld [vmem:[#allocation8 + $0x8] sm:$0xff]  ;;  %v588_v9 = vld [vmem:[#allocation8 + $0x10] sm:$0xff]  ;;  %s2312_s19 = scalar_lea.vmem [#allocation11], %s2242_s21  ;;  %s1329_s4 = sshll.u32 %s2014_s13, 9 }
  0xc3   : > { %1490 = vmatprep.subr.bf16.mxu0 %v1489_v3  ;;  %v589_v10 = vld [vmem:[#allocation8 + $0x18] sm:$0xff]  ;;  %v1513_v11 = vpack.c.bf16 %v587_v8, %v586_v7  ;;  %v450_v13 = vld [vmem:[%s2254_s2 + $0x8] sm:$0xff]  ;;  %v451_v14 = vld [vmem:[%s2254_s2 + $0x10] sm:$0xff]  ;;  %s1104_s29 = sshll.u32 %s2312_s19, 4  ;;  %s2338_s22 = scalar_lea.hbm %s2430_s8, %s1329_s4  ;;  %s2330_s29 = int_to_ptr.vmem [resolvable:$true] %s1104_s29 }
  0xc4   : > { %1492 = vmatpush3.bf16.msra.mxu0 %v1489_v3  ;;  %v1517_v12 = vpack.c.bf16 %v589_v10, %v588_v9  ;;  %v452_v15 = vld [vmem:[%s2254_s2 + $0x18] sm:$0xff]  ;;  %v595_v16 = vld [vmem:[#allocation8 + $0x40] sm:$0xff]  ;;  %v596_v17 = vld [vmem:[#allocation8 + $0x48] sm:$0xff]  ;;  %s1086_s0 = scalar_lea.sflag [#allocation4], %s2239_s16  ;;  %s1820_s9 = scalar_lea.vmem %s2330_s29, 512 }
  0xc5   : > { %1494 = vmatprep.subr.bf16.mxu0 %v1493_v6  ;;  %1514 = vmatprep.subr.bf16.mxu1 %v1513_v11  ;;  %v1497_v18 = vpack.c.bf16 %v596_v17, %v595_v16  ;;  %v590_v19 = vld [vmem:[#allocation8 + $0x20] sm:$0xff]  ;;  %v591_v20 = vld [vmem:[#allocation8 + $0x28] sm:$0xff]  ;;  %v597_v22 = vld [vmem:[#allocation8 + $0x50] sm:$0xff]  ;;  %p1821_p2 = scmp.ne.s32.totalorder %s2330_s29, %s1820_s9 }
  0xc6   : > { %1516 = vmatpush3.bf16.msra.mxu1 %v1513_v11  ;;  %v1521_v21 = vpack.c.bf16 %v591_v20, %v590_v19  ;;  %v598_v23 = vld [vmem:[#allocation8 + $0x58] sm:$0xff]  ;;  %v592_v24 = vld [vmem:[#allocation8 + $0x30] sm:$0xff]  ;;  %v599_v28 = vld [vmem:[#allocation8 + $0x60] sm:$0xff] }
  0xc7   : > { %1518 = vmatprep.subr.bf16.mxu1 %v1517_v12  ;;  %v593_v25 = vld [vmem:[#allocation8 + $0x38] sm:$0xff]  ;;  %v1501_v26 = vpack.c.bf16 %v598_v23, %v597_v22  ;;  %v600_v29 = vld [vmem:[#allocation8 + $0x68] sm:$0xff]  ;;  %v803_v30 = vld [vmem:[#allocation8 + $0x80] sm:$0xff]  ;;  %p1822_p4 = pnand %p1821_p2, %p2147_p5 }
  0xc8   : > { %1496 = vmatpush3.bf16.msra.mxu0 %v1493_v6  ;;  %v1525_v27 = vpack.c.bf16 %v593_v25, %v592_v24  ;;  %v804_v31 = vld [vmem:[#allocation8 + $0x88] sm:$0xff]  ;;  %v1505_v32 = vpack.c.bf16 %v600_v29, %v599_v28  ;;  %v601_v34 = vld [vmem:[#allocation8 + $0x70] sm:$0xff]  ;;  %v602_v35 = vld [vmem:[#allocation8 + $0x78] sm:$0xff] }
  0xc9   : > { %1498 = vmatprep.subr.bf16.mxu0 %v1497_v18  ;;  %v1529_v33 = vpack.c.bf16 %v804_v31, %v803_v30  ;;  %v1509_v36 = vpack.c.bf16 %v602_v35, %v601_v34  ;;  %v446_v37 = vld [vmem:[%s2246_s25 + $0x8] sm:$0xff]  ;;  %v445_v38 = vld [vmem:[%s2246_s25] sm:$0xff]  ;;  %v448_v44 = vld [vmem:[%s2246_s25 + $0x18] sm:$0xff]  ;;  %p1823_p0 = pneg %p1822_p4 }
  0xca   : > { %1520 = vmatpush3.bf16.msra.mxu1 %v1517_v12  ;;  %v1300_v40 = vld [vmem:[%s2425_s3] ss:$0 sm:$0xff]  ;;  %v447_v46 = vld [vmem:[%s2246_s25 + $0x10] sm:$0xff]  ;;  %v806_v53 = vld [vmem:[#allocation8 + $0x98] sm:$0xff]  ;;  %s1939_s25 = smov [#allocation11]  }
  0xcb   : > { %1396 = vmatmul.mubr.msk.f32.vlgmr.msra.gmra.mrb[0].mxu0 %vm457_vm0, %v450_v13  ;;  %1522 = vmatprep.subr.bf16.mxu1 %v1521_v21  ;;  %v805_v52 = vld [vmem:[#allocation8 + $0x90] sm:$0xff]  ;;  %v807_v61 = vld [vmem:[#allocation8 + $0xa0] sm:$0xff]  ;;  %v808_v62 = vld [vmem:[#allocation8 + $0xa8] sm:$0xff]  ;;  %s1824_s17 = sshll.u32 %s1939_s25, 4  ;;  %s1825_s17 = int_to_ptr.vmem [resolvable:$false] %s1824_s17 }
  0xcc   : > { %1398 = vmatprep.mubr.msk.f32.mxu0 %vm457_vm0, %v451_v14  ;;  %1500 = vmatpush3.bf16.msra.mxu0 %v1497_v18  ;;  %v1533_v60 = vpack.c.bf16 %v806_v53, %v805_v52  ;;  %v1537_v7 = vpack.c.bf16 %v808_v62, %v807_v61  ;;  %v809_v8 = vld [vmem:[#allocation8 + $0xb0] sm:$0xff]  ;;  %v810_v9 = vld [vmem:[#allocation8 + $0xb8] sm:$0xff]  ;;  %s1826_s18 = scalar_lea.vmem %s1825_s17, 1024  ;;  %p1827_p8 = scmp.lt.s32.totalorder %s2330_s29, %s1825_s17 }
  0xcd   : > { %1502 = vmatprep.subr.bf16.mxu0 %v1501_v26  ;;  %v1541_v19 = vpack.c.bf16 %v810_v9, %v809_v8  ;;  %v935_v29 = vld [vmem:[#allocation10 + $0x10] sm:$0xff]  ;;  %v936_v30 = vld [vmem:[#allocation10 + $0x18] sm:$0xff]  ;;  %p1828_p6 = scmp.lt.s32.totalorder %s1826_s18, %s1820_s9 }
  0xce   : > { %1524 = vmatpush3.bf16.msra.mxu1 %v1521_v21  ;;  %v1549_v31 = vpack.c.bf16 %v936_v30, %v935_v29  ;;  %v939_v35 = vld [vmem:[#allocation10 + $0x30] sm:$0xff] }
  0xcf   : > { %1399 = vmatmul.mubr.msk.f32.gmra.mrb[2].mxu0 %vm457_vm0, %v452_v15  ;;  %1526 = vmatprep.subr.bf16.mxu1 %v1525_v27  ;;  %p1829_p10 = por %p1828_p6, %p1827_p8 }
  0xd0   : > { %1504 = vmatpush3.bf16.msra.mxu0 %v1501_v26  ;;  %v933_v26 = vld [vmem:[#allocation10] sm:$0xff] }
  0xd1   : > { %1506 = vmatprep.subr.bf16.mxu0 %v1505_v32  ;;  %p1830_p3 = pnand %p1829_p10, %p1823_p0 }
  0xd2   : > { %1528 = vmatpush3.bf16.msra.mxu1 %v1525_v27  ;;  %v934_v27 = vld [vmem:[#allocation10 + $0x8] sm:$0xff] }
  0xd3   : > { %1530 = vmatprep.subr.bf16.mxu1 %v1529_v33  ;;  %v1545_v28 = vpack.c.bf16 %v934_v27, %v933_v26 }
  0xd4   : > { %1508 = vmatpush3.bf16.msra.mxu0 %v1505_v32  ;;  %v937_v32 = vld [vmem:[#allocation10 + $0x20] sm:$0xff] }
  0xd5   : > { %1510 = vmatprep.subr.bf16.mxu0 %v1509_v36 }
  0xd8   : > { %1512 = vmatpush3.bf16.msra.mxu0 %v1509_v36  ;;  %v940_v36 = vld [vmem:[#allocation10 + $0x38] sm:$0xff] }
  0xd9   : > { %1546 = vmatprep.subr.bf16.mxu0 %v1545_v28 }
 0x19e   : > { %v1397_v39 = vpop.f32.mrb[0].mxu0 }
 0x19f   : > { %v556_v41 = vadd.f32 %v1397_v39, %v446_v37  ;;  %v536_v42 = vpop.f32.mrb[1].mxu0  ;;  %v1557_v37 = vpack.c.bf16 %v940_v36, %v939_v35 }
 0x1a0   : > { %v555_v43 = vadd.f32 %v536_v42, %v445_v38 }
 0x1a1   : > { %v567_v45 = vadd.f32 %v1300_v40, %v556_v41 }
 0x1a2   : > { %v566_v47 = vadd.f32 %v1300_v40, %v555_v43  ;;  %v1400_v48 = vpop.f32.mrb[2].mxu0  ;;  %v1313_v43 = vld [vmem:[%s2427_s5] ss:$0 sm:$0xff] }
 0x1a3   : > { %v576_v49 = vrot.slane %v567_v45, 7  ;;  %v558_v50 = vadd.f32 %v1400_v48, %v448_v44  ;;  %v546_v51 = vpop.f32.mrb[3].mxu0 }
 0x1a4   : > { %v575_v54 = vrot.slane %v566_v47, 7  ;;  %v557_v55 = vadd.f32 %v546_v51, %v447_v46 }
 0x1a5   : > { %v569_v56 = vadd.f32 %v1300_v40, %v558_v50 }
 0x1a6   : > { %v568_v57 = vadd.f32 %v1300_v40, %v557_v55  ;;  %v584_v58 = vsel %vm574_vm1, 0.0, %v575_v54  ;;  %v577_v59 = vsel %vm574_vm1, %v575_v54, %v576_v49  ;;  %v1314_v55 = vld [vmem:[%s2429_s7] ss:$0 sm:$0xff] }
 0x1a7   : > { %v580_v63 = vrot.slane %v569_v56, 7  ;;  %v606_v0 = vrot.slane %v584_v58, 1  ;;  %1439 = vmatprep.mubr.msk.f32.mxu1 %vm615_vm2, %v584_v58  ;;  %v607_v1 = vrot.slane %v577_v59, 1  ;;  %v812_v3 = vrot.slane %v584_v58, 2 }
 0x1a8   : > { %v578_v2 = vrot.slane %v568_v57, 7  ;;  %1440 = vmatmul.mubr.msk.f32.vlgmr.msra.gmra.mrb[0].mxu1 %vm615_vm2, %v577_v59  ;;  %v813_v4 = vrot.slane %v577_v59, 2 }
 0x1a9   : > { %v585_v5 = vsel %vm574_vm1, %v580_v63, 0.0  ;;  %1532 = vmatpush3.bf16.msra.mxu1 %v1529_v33  ;;  %v608_v6 = vsel %vm605_vm3, %v606_v0, %v607_v1  ;;  %v938_v33 = vld [vmem:[#allocation10 + $0x28] sm:$0xff] }
 0x1aa   : > { %v613_v10 = vrot.slane %v585_v5, 1  ;;  %v819_v11 = vrot.slane %v585_v5, 2  ;;  %1417 = vmatprep.mubr.msk.f32.mxu0 %vm615_vm2, %v608_v6  ;;  %v579_v12 = vsel %vm574_vm1, %v576_v49, %v578_v2  ;;  %1534 = vmatprep.subr.bf16.mxu1 %v1533_v60  ;;  %v581_v13 = vsel %vm574_vm1, %v578_v2, %v580_v63 }
 0x1ab   : > { %v609_v14 = vrot.slane %v579_v12, 1  ;;  %1442 = vmatprep.mubr.msk.f32.mxu1 %vm615_vm2, %v579_v12  ;;  %v815_v15 = vrot.slane %v579_v12, 2  ;;  %v611_v16 = vrot.slane %v581_v13, 1  ;;  %v817_v17 = vrot.slane %v581_v13, 2 }
 0x1ac   : > { %1443 = vmatmul.mubr.msk.f32.gmra.mrb[2].mxu1 %vm615_vm2, %v581_v13  ;;  %v814_v18 = vsel %vm811_vm4, %v812_v3, %v813_v4  ;;  %v1553_v34 = vpack.c.bf16 %v938_v33, %v937_v32 }
 0x1ad   : > { %1536 = vmatpush3.bf16.msra.mxu1 %v1533_v60  ;;  %1461 = vmatprep.mubr.msk.f32.mxu1 %vm615_vm2, %v814_v18  ;;  %v610_v20 = vsel %vm605_vm3, %v607_v1, %v609_v14  ;;  %v612_v21 = vsel %vm605_vm3, %v609_v14, %v611_v16  ;;  %v614_v22 = vsel %vm605_vm3, %v611_v16, %v613_v10 }
 0x1ae   : > { %1418 = vmatmul.mubr.msk.f32.vlgmr.msra.gmra.mrb[4].mxu0 %vm615_vm2, %v610_v20  ;;  %1538 = vmatprep.subr.bf16.mxu1 %v1537_v7  ;;  %v816_v23 = vsel %vm811_vm4, %v813_v4, %v815_v15  ;;  %v818_v24 = vsel %vm811_vm4, %v815_v15, %v817_v17  ;;  %v820_v25 = vsel %vm811_vm4, %v817_v17, %v819_v11 }
 0x1af   : > { %1420 = vmatprep.mubr.msk.f32.mxu0 %vm615_vm2, %v612_v21  ;;  %1548 = vmatpush3.bf16.msra.mxu0 %v1545_v28 }
 0x1b0   : > { %1550 = vmatprep.subr.bf16.mxu0 %v1549_v31 }
 0x1b1   : > { %1540 = vmatpush3.bf16.msra.mxu1 %v1537_v7 }
 0x1b2   : > { %1421 = vmatmul.mubr.msk.f32.gmra.mrb[6].mxu0 %vm615_vm2, %v614_v22  ;;  %1542 = vmatprep.subr.bf16.mxu1 %v1541_v19 }
 0x1b3   : > { %1552 = vmatpush3.bf16.msra.mxu0 %v1549_v31 }
 0x1b4   : > { %1554 = vmatprep.subr.bf16.mxu0 %v1553_v34 }
 0x1b5   : > { %1544 = vmatpush3.bf16.msra.mxu1 %v1541_v19 }
 0x1b7   : > { %1556 = vmatpush3.bf16.msra.mxu0 %v1553_v34 }
 0x1b8   : > { %1462 = vmatmul.mubr.msk.f32.vlgmr.msra.gmra.mrb[0].mxu1 %vm615_vm2, %v816_v23  ;;  %1558 = vmatprep.subr.bf16.mxu0 %v1557_v37 }
 0x1b9   : > { %1464 = vmatprep.mubr.msk.f32.mxu1 %vm615_vm2, %v818_v24 }
 0x1bb   : > { %1560 = vmatpush3.bf16.msra.mxu0 %v1557_v37 }
 0x1bc   : > { %1465 = vmatmul.mubr.msk.f32.gmra.mrb[2].mxu1 %vm615_vm2, %v820_v25 }
 0x281   : > { %v1419_v38 = vpop.f32.mrb[4].mxu0 }
 0x282   : > { %v690_v39 = vpop.f32.mrb[5].mxu0 }
 0x285   : > { %v1422_v40 = vpop.f32.mrb[6].mxu0 }
 0x286   : > { %v700_v41 = vpop.f32.mrb[7].mxu0 }
 0x28b   : > { %v1463_v42 = vpop.f32.mrb[0].mxu1 }
 0x28c   : > { %v1561_v44 = vadd.f32 %v1463_v42, %v1419_v38  ;;  %v895_v45 = vpop.f32.mrb[1].mxu1 }
 0x28d   : > { %v1562_v46 = vadd.f32 %v895_v45, %v690_v39 }
 0x28e   : > { %v926_v47 = vadd.f32 %v1561_v44, %v1313_v43 }
 0x28f   : > { %v925_v48 = vadd.f32 %v1562_v46, %v1313_v43  ;;  %v1466_v49 = vpop.f32.mrb[2].mxu1 }
 0x290   : > { %930 = vst.msk [vmem:[%s2312_s19 + $0x8] sm:$0xff] %vm615_vm2, %v926_v47  ;;  %v1563_v50 = vadd.f32 %v1466_v49, %v1422_v40  ;;  %v905_v51 = vpop.f32.mrb[3].mxu1 }
 0x291   : > { %929 = vst.msk [vmem:[%s2312_s19] sm:$0xff] %vm615_vm2, %v925_v48  ;;  %v1564_v52 = vadd.f32 %v905_v51, %v700_v41  ;;  %1483 = vmatprep.mubr.msk.f32.mxu0 %vm615_vm2, %v925_v48 }
 0x292   : > { %v928_v53 = vadd.f32 %v1563_v50, %v1313_v43  ;;  %1484 = vmatmul.mubr.msk.f32.vlgmr.msra.gmra.mrb[8].mxu0 %vm615_vm2, %v926_v47 }
 0x293   : > { %v927_v54 = vadd.f32 %v1564_v52, %v1313_v43 }
 0x294   : > { %932 = vst.msk [vmem:[%s2312_s19 + $0x18] sm:$0xff] %vm615_vm2, %v928_v53 }
 0x295   : > { %931 = vst.msk [vmem:[%s2312_s19 + $0x10] sm:$0xff] %vm615_vm2, %v927_v54  ;;  %1486 = vmatprep.mubr.msk.f32.mxu0 %vm615_vm2, %v927_v54 }
 0x296   : > { %1487 = vmatmul.mubr.msk.f32.gmra.mrb[10].mxu0 %vm615_vm2, %v928_v53 }
 0x365   : > { %v1485_v56 = vpop.f32.mrb[8].mxu0 }
 0x366   : > { %v1026_v57 = vpop.f32.mrb[9].mxu0  ;;  %v1032_v61 = vadd.f32 %v1485_v56, %v1314_v55 }
 0x367   : > { %v1027_v58 = vadd.f32 %v1314_v55, %v1026_v57 }
 0x369   : > { %1045 = vmax.xlane.f32.xlu0 %v1027_v58  ;;  %v1488_v59 = vpop.f32.mrb[10].mxu0 }
 0x36a   : > { %v1036_v60 = vpop.f32.mrb[11].mxu0  ;;  %v1042_v63 = vadd.f32 %v1488_v59, %v1314_v55 }
 0x36b   : > { %v1037_v62 = vadd.f32 %v1314_v55, %v1036_v60 }
 0x36d   : > { %1047 = vmax.xlane.f32.xlu0 %v1032_v61  ;;  %1049 = vmax.xlane.f32.xlu1 %v1037_v62 }
 0x371   : > { %1051 = vmax.xlane.f32.xlu1 %v1042_v63 }
 0x3f6   : > { %v1046_v0 = vpop.xlane.xlu0 %1045 }
 0x3f7   : > { %v1053_v1 = vsub.f32 %v1027_v58, %v1046_v0 }
 0x3f9   : > { %v1057_v2 = vmul.f32 1.442695, %v1053_v1 }
 0x3fa   : > { %v1048_v3 = vpop.xlane.xlu0 %1047  ;;  %v1050_v4 = vpop.xlane.xlu1 %1049 }
 0x3fb   : > { %1660 = vpow2.f32 %v1057_v2  ;;  %v1054_v5 = vsub.f32 %v1032_v61, %v1048_v3  ;;  %v1055_v6 = vsub.f32 %v1037_v62, %v1050_v4 }
 0x3fd   : > { %v1059_v7 = vmul.f32 1.442695, %v1054_v5  ;;  %v1061_v8 = vmul.f32 1.442695, %v1055_v6 }
 0x3fe   : > { %v1052_v9 = vpop.xlane.xlu1 %1051 }
 0x3ff   : > { %1662 = vpow2.f32 %v1059_v7  ;;  %v1056_v10 = vsub.f32 %v1042_v63, %v1052_v9 }
 0x400   : > { %1664 = vpow2.f32 %v1061_v8 }
 0x401   : > { %v1063_v11 = vmul.f32 1.442695, %v1056_v10 }
 0x403   : > { %1666 = vpow2.f32 %v1063_v11 }
 0x405   : > { %v1661_v12 = vpop.eup %1660 }
 0x406   : > { %1065 = vadd.xlane.f32.xlu0 %v1661_v12 }
 0x409   : > { %v1663_v13 = vpop.eup %1662 }
 0x40a   : > { %v1665_v14 = vpop.eup %1664  ;;  %1067 = vadd.xlane.f32.xlu1 %v1663_v13 }
 0x40b   : > { %1069 = vadd.xlane.f32.xlu0 %v1665_v14 }
 0x40d   : > { %v1667_v15 = vpop.eup %1666 }
 0x40e   : > { %1071 = vadd.xlane.f32.xlu1 %v1667_v15 }
 0x40f   : > { %1833 = shalt.err (!%p1830_p3)
}
 0x410   : > { %s1834_s2 = scalar_lea.hbm %s2338_s22, 512  ;;  %s1838_s20 = scalar_lea.hbm %s2430_s8, 1024 }
 0x411   : > { %p1835_p9 = scmp.ne.s32.totalorder %s2338_s22, %s1834_s2  ;;  %p1839_p7 = scmp.lt.u32.totalorder %s2338_s22, %s2430_s8 }
 0x412   : > { %p1840_p12 = scmp.lt.u32.totalorder %s1838_s20, %s1834_s2  ;;  %p1842_p2 = scmp.lt.u32.totalorder %s1834_s2, %s2338_s22 }
 0x413   : > { %p1836_p13 = pnand %p1835_p9, %p2147_p5 }
 0x414   : > { %p1841_p1 = por %p1840_p12, %p1839_p7 }
 0x415   : > { %p1837_p11 = pneg %p1836_p13 }
 0x416   : > { %p1843_p4 = por %p1842_p2, %p1841_p1 }
 0x418   : > { %p1844_p0 = pnand %p1843_p4, %p1837_p11 }
 0x41a   : > { %1847 = shalt.err (!%p1844_p0)
}
 0x41b   : > { %s1940_s28 = smov 128   ;;  %s1941_s26 = smov 8  }
 0x41c   : > { %1585 = dma.vmem_to_hbm [thread:$0]  (%p2147_p5), %s2330_s29, 512, %s2338_s22, %s1086_s0, %s1940_s28, %s1940_s28, %s1941_s26  }
 0x41d   : > { %s444_s24 = scalar_lea.vmem [#allocation12], %s2242_s21  ;;  %s2470_s0 = sld [smem:[#allocation27_spill]] }
 0x41e   : > { %s1120_s29 = sshll.u32 %s444_s24, 4  ;;  %s1091_s21 = scalar_lea.sflag [#allocation13], %s2239_s16  ;;  %s2375_s29 = int_to_ptr.vmem [resolvable:$true] %s1120_s29 }
 0x41f   : > { %s1848_s25 = scalar_lea.vmem %s2375_s29, 512  ;;  %s1942_s17 = smov [#allocation12]  }
 0x420   : > { %p1849_p8 = scmp.ne.s32.totalorder %s2375_s29, %s1848_s25  ;;  %s1852_s18 = sshll.u32 %s1942_s17, 4  ;;  %s1853_s18 = int_to_ptr.vmem [resolvable:$false] %s1852_s18 }
 0x421   : > { %s1854_s13 = scalar_lea.vmem %s1853_s18, 1024  ;;  %p1855_p3 = scmp.lt.s32.totalorder %s2375_s29, %s1853_s18 }
 0x422   : > { %p1850_p6 = pnand %p1849_p8, %p2147_p5  ;;  %p1856_p9 = scmp.lt.s32.totalorder %s1854_s13, %s1848_s25 }
 0x423   : > { %s2373_s9 = scalar_lea.hbm %s2470_s0, %s1329_s4 }
 0x424   : > { %p1851_p10 = pneg %p1850_p6  ;;  %p1857_p13 = por %p1856_p9, %p1855_p3 }
 0x426   : > { %p1858_p11 = pnand %p1857_p13, %p1851_p10 }
 0x493   : > { %v1066_v16 = vpop.xlane.xlu0 %1065 }
 0x494   : > { %1668 = vrcp.f32 %v1066_v16 }
 0x497   : > { %v1068_v17 = vpop.xlane.xlu1 %1067 }
 0x498   : > { %v1070_v18 = vpop.xlane.xlu0 %1069  ;;  %1670 = vrcp.f32 %v1068_v17 }
 0x499   : > { %1672 = vrcp.f32 %v1070_v18 }
 0x49b   : > { %v1072_v19 = vpop.xlane.xlu1 %1071 }
 0x49c   : > { %1674 = vrcp.f32 %v1072_v19 }
 0x49e   : > { %v1669_v20 = vpop.eup %1668 }
 0x49f   : > { %v1074_v21 = vmul.f32 %v1669_v20, %v1661_v12 }
 0x4a1   : > { %1081 = vst [vmem:[%s444_s24] sm:$0xff] %v1074_v21 }
 0x4a2   : > { %v1671_v22 = vpop.eup %1670 }
 0x4a3   : > { %v1673_v23 = vpop.eup %1672  ;;  %v1076_v24 = vmul.f32 %v1671_v22, %v1663_v13 }
 0x4a4   : > { %v1078_v25 = vmul.f32 %v1673_v23, %v1665_v14 }
 0x4a5   : > { %1082 = vst [vmem:[%s444_s24 + $0x8] sm:$0xff] %v1076_v24 }
 0x4a6   : > { %v1675_v26 = vpop.eup %1674  ;;  %1083 = vst [vmem:[%s444_s24 + $0x10] sm:$0xff] %v1078_v25 }
 0x4a7   : > { %v1080_v27 = vmul.f32 %v1675_v26, %v1667_v15 }
 0x4a9   : > { %1084 = vst [vmem:[%s444_s24 + $0x18] sm:$0xff] %v1080_v27 }
 0x4aa   : > { %1861 = shalt.err (!%p1858_p11)
}
 0x4ab   : > { %s1862_s4 = scalar_lea.hbm %s2373_s9, 512  ;;  %s1866_s6 = scalar_lea.hbm %s2470_s0, 1024 }
 0x4ac   : > { %p1863_p7 = scmp.ne.s32.totalorder %s2373_s9, %s1862_s4  ;;  %p1867_p2 = scmp.lt.u32.totalorder %s2373_s9, %s2470_s0 }
 0x4ad   : > { %p1868_p4 = scmp.lt.u32.totalorder %s1866_s6, %s1862_s4  ;;  %p1870_p8 = scmp.lt.u32.totalorder %s1862_s4, %s2373_s9 }
 0x4ae   : > { %p1864_p12 = pnand %p1863_p7, %p2147_p5 }
 0x4af   : > { %p1869_p0 = por %p1868_p4, %p1867_p2 }
 0x4b0   : > { %p1865_p1 = pneg %p1864_p12 }
 0x4b1   : > { %p1871_p6 = por %p1870_p8, %p1869_p0 }
 0x4b3   : > { %p1872_p10 = pnand %p1871_p6, %p1865_p1 }
 0x4b5   : > { %1875 = shalt.err (!%p1872_p10)
}
 0x4b6   : > { %1586 = dma.vmem_to_hbm [thread:$0]  (%p2147_p5), %s2375_s29, 512, %s2373_s9, %s1091_s21, %s1940_s28, %s1940_s28, %s1941_s26  }
 0x4b7 PF: > { %s2471_s19 = sld [smem:[#allocation20_spill]]  ;;  %s2472_s24 = sld [smem:[#allocation21_spill]] }
 0x4b8   : > { %p2474_p9 = scmp.ge.s32.totalorder %s1930_s12, 2 }
 0x4bd   : > { %s1135_s23 = sand.u32 1, %s2471_s19   ;;  %p2473_p3 = scmp.ne.s32.totalorder %s2472_s24, 0 }
 0x4be   : > { %s1136_s22 = scalar_lea.sflag [#allocation4], %s1135_s23 }
 0x4bf   : > { %p1607_p13 = pnand %p2474_p9, %p2473_p3 }
 0x4c1   : > { %1909 = dma.done.wait (!%p1607_p13), %s1136_s22, 512  }
 0x4c2   : > { %1911 = vsyncadd (!%p1607_p13), %s1136_s22, 4294966784  ;;  %s1145_s27 = scalar_lea.sflag [#allocation13], %s1135_s23 }
 0x4c3   : > { %1913 = dma.done.wait (!%p1607_p13), %s1145_s27, 512  }
 0x4c4   : > { %1915 = vsyncadd (!%p1607_p13), %s1145_s27, 4294966784  ;;  %s2475_s16 = sld [smem:[#allocation22_spill]]  ;;  %p30_p5 = scmp.ge.s32.totalorder %s2133_s14, 4  }
 0x4c5   : > { %s2476_s30 = smov %s1922_s10  ;;  %s2477_s10 = smov %s1926_s11 }
 0x4c6   : > { %s2479_s12 = smov %s2133_s14  ;;  %32 = sbr.rel (!%p30_p5) target bundleno = 16 (0x10), region = 141 }
 0x4ca   : > { %s2478_s11 = smov %s2475_s16 }
 0x4cd   :  { %1150 = vsyncpa [#allocation3], 1 }
 0x4ce   :  { %1152 = vsyncpa [#allocation3 + $0x1], 1 }
 0x4cf   :  { %1153 = vsyncpa [#allocation6], 1 }
 0x4d0   :  { %1155 = vsyncpa [#allocation6 + $0x1], 1 }
 0x4d1   :  { %1156 = vsyncpa [#allocation9], 1 }
 0x4d2   :  { %1157 = vsyncpa [#allocation4], 1 }
 0x4d3   :  { %1159 = vsyncpa [#allocation4 + $0x1], 1 }
 0x4d4   :  { %1160 = vsyncpa [#allocation13], 1 }
 0x4d5   :  { %1162 = vsyncpa [#allocation13 + $0x1], 1 }

</bundles_post_ra>
